<compile_context>
chip_gen: v7x
topology: tpu7x:2x2x1
jax: 0.10.0
libtpu: 0.0.40
codegen_flags: <defaults>
</compile_context>

<pallas_src>
import functools

import jax
import jax.numpy as jnp
from jax.experimental import pallas as pl
from jax.experimental.pallas import tpu as pltpu

KH, KW = 3, 3


def _round_up(x, m):
    return ((x + m - 1) // m) * m


def _default_channel_groups():
    """2 on chips with two TensorCores (v4 / v5p / v7x), else 1."""
    try:
        kind = jax.devices()[0].device_kind.lower()
    except Exception:
        return 1
    return 2 if any(t in kind for t in ("v7", "v4", "v5p")) else 1


def _add_dwconv_kernel(xa_ref, xb_ref, m_ref, w_ref, o_ref, xpad_ref, *, W, PAD, CHUNK):
    """One (batch, channel-group) step of  out = dwconv3x3(xa + xb, pad=1).

    xa_ref, xb_ref, o_ref : (Cg, H*W)  lane-dense blocks
    m_ref                 : (2, H*W)   row0: 0 where w==0 (guards w-1 taps),
                                       row1: 0 where w==W-1 (guards w+1 taps)
    w_ref                 : (Cg, 9)    per-channel taps, tap index = kh*3 + kw
    xpad_ref (scratch)    : (Cg, PAD + H*W + PAD) f32 fused input with zeroed halos
    """
    Cg, HW = o_ref.shape

    # Zero the halo regions once per grid step (covers h-1 / h+1 reads at the
    # top / bottom image rows). PAD is a multiple of 128 -> unmasked full-lane stores.
    zpad = jnp.zeros((Cg, PAD), jnp.float32)
    xpad_ref[:, 0:PAD] = zpad
    xpad_ref[:, PAD + HW:PAD + HW + PAD] = zpad

    w = w_ref[...].astype(jnp.float32)                      # (Cg, 9), tiny & resident
    w_taps = [w[:, t:t + 1] for t in range(KH * KW)]        # hoisted (Cg, 1) slices

    nfull = HW // CHUNK
    tail = HW % CHUNK
    chunks = [(i * CHUNK, CHUNK) for i in range(nfull)]
    if tail:
        chunks.append((nfull * CHUNK, tail))

    # Pass 1: fused add (single f32 upcast) streamed chunk-wise into the padded scratch.
    for base, size in chunks:
        xpad_ref[:, PAD + base:PAD + base + size] = (
            xa_ref[:, base:base + size].astype(jnp.float32)
            + xb_ref[:, base:base + size].astype(jnp.float32))

    # Pass 2: 9-tap accumulate. All offsets are static; temporaries stay vreg-sized.
    for base, size in chunks:
        ml = m_ref[0:1, base:base + size]    # valid mask for taps reading column w-1
        mr = m_ref[1:2, base:base + size]    # valid mask for taps reading column w+1
        acc = None
        for kw, dw, mask in ((0, -1, ml), (1, 0, None), (2, 1, mr)):
            col = None
            for kh in range(KH):
                dh = kh - 1
                off = PAD + base + dh * W + dw
                v = xpad_ref[:, off:off + size]            # row shifts read the zero halo
                term = v * w_taps[kh * KW + kw]            # (Cg,1) lane-broadcast weight
                col = term if col is None else col + term
            if mask is not None:
                col = col * mask                           # destination column-edge mask
            acc = col if acc is None else acc + col
        o_ref[:, base:base + size] = acc.astype(o_ref.dtype)


def add_depthwise_conv(x26, x14, weight, *, channel_groups=None):
    """x26, x14: (N, C, H, W); weight: (C, 1, 3, 3) PyTorch-style depthwise weight."""
    N, C, H, W = x26.shape
    assert x14.shape == (N, C, H, W)
    assert weight.shape == (C, 1, KH, KW)
    HW = H * W

    G = _default_channel_groups() if channel_groups is None else int(channel_groups)
    G = max(1, G)
    while G > 1 and not (C % G == 0 and (C // G) % 8 == 0):
        G -= 1
    Cg = C // G

    # Halo pad (>= W+1, lane aligned) so every +-W / +-1 tap read stays in bounds.
    PAD = max(128, _round_up(W + 1, 128))

    # Lane chunk size: keep the per-chunk accumulator around <= 8 vregs.
    CHUNK = min(max(128, ((8 * 1024) // Cg) // 128 * 128), HW)

    # Pure reshapes -- no transpose, no padding, no extra HBM round trips.
    xa = x26.reshape(N, C, HW)
    xb = x14.reshape(N, C, HW)
    w2d = weight.reshape(C, KH * KW).astype(jnp.float32)    # (C, 9), tap = kh*3 + kw

    # Grid-invariant column-edge masks, built once in the wrapper (no in-kernel iota).
    col = jnp.arange(HW, dtype=jnp.int32) % W
    masks = jnp.stack([(col != 0).astype(jnp.float32),
                       (col != W - 1).astype(jnp.float32)], axis=0)   # (2, HW)

    kernel = functools.partial(_add_dwconv_kernel, W=W, PAD=PAD, CHUNK=CHUNK)

    itemsize = jnp.dtype(x26.dtype).itemsize
    est = (2 * 2 * Cg * HW * itemsize          # xa, xb blocks, double-buffered
           + 2 * Cg * HW * itemsize            # output block, double-buffered
           + Cg * (HW + 2 * PAD) * 4           # fused-input scratch
           + 2 * 2 * HW * 4                    # edge masks
           + 2 * C * 128 * 4)                  # weights (lane padded)
    vmem_limit = int(min(max(2 * est, 24 * 1024 * 1024), 56 * 1024 * 1024))

    out = pl.pallas_call(
        kernel,
        out_shape=jax.ShapeDtypeStruct((N, C, HW), x26.dtype),
        grid=(N, G),
        in_specs=[
            pl.BlockSpec((None, Cg, HW), lambda n, g: (n, g, 0)),
            pl.BlockSpec((None, Cg, HW), lambda n, g: (n, g, 0)),
            pl.BlockSpec((2, HW), lambda n, g: (0, 0)),        # masks: resident
            pl.BlockSpec((Cg, KH * KW), lambda n, g: (g, 0)),  # weights
        ],
        out_specs=pl.BlockSpec((None, Cg, HW), lambda n, g: (n, g, 0)),
        scratch_shapes=[pltpu.VMEM((Cg, PAD + HW + PAD), jnp.float32)],
        compiler_params=pltpu.CompilerParams(
            dimension_semantics=("parallel", "parallel"),
            vmem_limit_bytes=vmem_limit),
    )(xa, xb, masks, w2d)

    return out.reshape(N, C, H, W)


def _reference(x26, x14, weight):
    x = x26 + x14
    return jax.lax.conv_general_dilated(
        x, weight,
        window_strides=(1, 1),
        padding=((1, 1), (1, 1)),
        dimension_numbers=("NCHW", "OIHW", "NCHW"),
        feature_group_count=x.shape[1],
    )


if __name__ == "__main__":
    key = jax.random.PRNGKey(0)
    k1, k2, k3 = jax.random.split(key, 3)

    # C=32 is fixed by the module's depthwise conv; small batch/spatial for the test.
    N, C, H, W = 2, 32, 16, 16
    x26 = jax.random.normal(k1, (N, C, H, W), dtype=jnp.float32)
    x14 = jax.random.normal(k2, (N, C, H, W), dtype=jnp.float32)
    weight = jax.random.normal(k3, (C, 1, KH, KW), dtype=jnp.float32) * 0.1

    out = add_depthwise_conv(x26, x14, weight)
    out = jax.block_until_ready(out)

    ref = _reference(x26, x14, weight)
    assert out.shape == ref.shape == (N, C, H, W)
    assert jnp.allclose(out, ref, atol=1e-4, rtol=1e-4), "mismatch vs reference conv"

    print("KERNEL_OK")
</pallas_src>

<mosaic_0001>
module attributes {stable_mosaic.version = 11 : i64} {
  func.func @_add_dwconv_kernel(%arg0: i32, %arg1: i32, %arg2: memref<1x32x256xf32, #tpu.memory_space<vmem>>, %arg3: memref<1x32x256xf32, #tpu.memory_space<vmem>>, %arg4: memref<2x256xf32, #tpu.memory_space<vmem>>, %arg5: memref<32x9xf32, #tpu.memory_space<vmem>>, %arg6: memref<1x32x256xf32, #tpu.memory_space<vmem>>, %arg7: memref<32x512xf32, #tpu.memory_space<vmem>>) attributes {dimension_semantics = [#tpu.dimension_semantics<parallel>, #tpu.dimension_semantics<parallel>], iteration_bounds = array<i64: 2, 1>, scalar_prefetch = 0 : i64, scratch_operands = 1 : i64, tpu.core_type = #tpu.core_type<tc>, window_params = [{transform_indices = @transform_0, window_bounds = array<i64: 1, 32, 256>}, {transform_indices = @transform_1, window_bounds = array<i64: 1, 32, 256>}, {pipeline_mode = #tpu.pipeline_mode<synchronous>, transform_indices = @transform_2, window_bounds = array<i64: 2, 256>}, {transform_indices = @transform_3, window_bounds = array<i64: 32, 9>}, {transform_indices = @transform_4, window_bounds = array<i64: 1, 32, 256>}]} {
    %cst = arith.constant 0.000000e+00 : f32
    %0 = vector.broadcast %cst : f32 to vector<32x128xf32>
    %c0 = arith.constant 0 : index
    %c0_0 = arith.constant 0 : index
    %1 = vector.load %arg7[%c0, %c0_0] : memref<32x512xf32, #tpu.memory_space<vmem>>, vector<32x128xf32>
    tpu.vector_store %arg7[%c0, %c0_0], %0 {strides = array<i32>} : memref<32x512xf32, #tpu.memory_space<vmem>>, vector<32x128xf32>,
    %c0_1 = arith.constant 0 : index
    %c384 = arith.constant 384 : index
    %2 = vector.load %arg7[%c0_1, %c384] : memref<32x512xf32, #tpu.memory_space<vmem>>, vector<32x128xf32>
    tpu.vector_store %arg7[%c0_1, %c384], %0 {strides = array<i32>} : memref<32x512xf32, #tpu.memory_space<vmem>>, vector<32x128xf32>,
    %c0_2 = arith.constant 0 : index
    %c0_3 = arith.constant 0 : index
    %3 = vector.load %arg5[%c0_2, %c0_3] : memref<32x9xf32, #tpu.memory_space<vmem>>, vector<32x9xf32>
    %4 = vector.extract_strided_slice %3 {offsets = [0, 0], sizes = [32, 1], strides = [1, 1]} : vector<32x9xf32> to vector<32x1xf32>
    %5 = vector.extract_strided_slice %3 {offsets = [0, 1], sizes = [32, 1], strides = [1, 1]} : vector<32x9xf32> to vector<32x1xf32>
    %6 = vector.extract_strided_slice %3 {offsets = [0, 2], sizes = [32, 1], strides = [1, 1]} : vector<32x9xf32> to vector<32x1xf32>
    %7 = vector.extract_strided_slice %3 {offsets = [0, 3], sizes = [32, 1], strides = [1, 1]} : vector<32x9xf32> to vector<32x1xf32>
    %8 = vector.extract_strided_slice %3 {offsets = [0, 4], sizes = [32, 1], strides = [1, 1]} : vector<32x9xf32> to vector<32x1xf32>
    %9 = vector.extract_strided_slice %3 {offsets = [0, 5], sizes = [32, 1], strides = [1, 1]} : vector<32x9xf32> to vector<32x1xf32>
    %10 = vector.extract_strided_slice %3 {offsets = [0, 6], sizes = [32, 1], strides = [1, 1]} : vector<32x9xf32> to vector<32x1xf32>
    %11 = vector.extract_strided_slice %3 {offsets = [0, 7], sizes = [32, 1], strides = [1, 1]} : vector<32x9xf32> to vector<32x1xf32>
    %12 = vector.extract_strided_slice %3 {offsets = [0, 8], sizes = [32, 1], strides = [1, 1]} : vector<32x9xf32> to vector<32x1xf32>
    %c0_4 = arith.constant 0 : index
    %c0_5 = arith.constant 0 : index
    %c0_6 = arith.constant 0 : index
    %13 = vector.load %arg2[%c0_4, %c0_5, %c0_6] : memref<1x32x256xf32, #tpu.memory_space<vmem>>, vector<1x32x256xf32>
    %14 = vector.shape_cast %13 : vector<1x32x256xf32> to vector<32x256xf32>
    %c0_7 = arith.constant 0 : index
    %c0_8 = arith.constant 0 : index
    %c0_9 = arith.constant 0 : index
    %15 = vector.load %arg3[%c0_7, %c0_8, %c0_9] : memref<1x32x256xf32, #tpu.memory_space<vmem>>, vector<1x32x256xf32>
    %16 = vector.shape_cast %15 : vector<1x32x256xf32> to vector<32x256xf32>
    %17 = arith.addf %14, %16 : vector<32x256xf32>
    %c0_10 = arith.constant 0 : index
    %c128 = arith.constant 128 : index
    %18 = vector.load %arg7[%c0_10, %c128] : memref<32x512xf32, #tpu.memory_space<vmem>>, vector<32x256xf32>
    tpu.vector_store %arg7[%c0_10, %c128], %17 {strides = array<i32>} : memref<32x512xf32, #tpu.memory_space<vmem>>, vector<32x256xf32>,
    %c0_11 = arith.constant 0 : index
    %c0_12 = arith.constant 0 : index
    %19 = vector.load %arg4[%c0_11, %c0_12] : memref<2x256xf32, #tpu.memory_space<vmem>>, vector<1x256xf32>
    %c1 = arith.constant 1 : index
    %c0_13 = arith.constant 0 : index
    %20 = vector.load %arg4[%c1, %c0_13] : memref<2x256xf32, #tpu.memory_space<vmem>>, vector<1x256xf32>
    %c0_14 = arith.constant 0 : index
    %c111 = arith.constant 111 : index
    %21 = vector.load %arg7[%c0_14, %c111] : memref<32x512xf32, #tpu.memory_space<vmem>>, vector<32x256xf32>
    %22 = vector.broadcast %4 : vector<32x1xf32> to vector<32x256xf32>
    %23 = arith.mulf %21, %22 : vector<32x256xf32>
    %c0_15 = arith.constant 0 : index
    %c127 = arith.constant 127 : index
    %24 = vector.load %arg7[%c0_15, %c127] : memref<32x512xf32, #tpu.memory_space<vmem>>, vector<32x256xf32>
    %25 = vector.broadcast %7 : vector<32x1xf32> to vector<32x256xf32>
    %26 = arith.mulf %24, %25 : vector<32x256xf32>
    %27 = arith.addf %23, %26 : vector<32x256xf32>
    %c0_16 = arith.constant 0 : index
    %c143 = arith.constant 143 : index
    %28 = vector.load %arg7[%c0_16, %c143] : memref<32x512xf32, #tpu.memory_space<vmem>>, vector<32x256xf32>
    %29 = vector.broadcast %10 : vector<32x1xf32> to vector<32x256xf32>
    %30 = arith.mulf %28, %29 : vector<32x256xf32>
    %31 = arith.addf %27, %30 : vector<32x256xf32>
    %32 = vector.broadcast %19 : vector<1x256xf32> to vector<32x256xf32>
    %33 = arith.mulf %31, %32 : vector<32x256xf32>
    %c0_17 = arith.constant 0 : index
    %c112 = arith.constant 112 : index
    %34 = vector.load %arg7[%c0_17, %c112] : memref<32x512xf32, #tpu.memory_space<vmem>>, vector<32x256xf32>
    %35 = vector.broadcast %5 : vector<32x1xf32> to vector<32x256xf32>
    %36 = arith.mulf %34, %35 : vector<32x256xf32>
    %c0_18 = arith.constant 0 : index
    %c128_19 = arith.constant 128 : index
    %37 = vector.load %arg7[%c0_18, %c128_19] : memref<32x512xf32, #tpu.memory_space<vmem>>, vector<32x256xf32>
    %38 = vector.broadcast %8 : vector<32x1xf32> to vector<32x256xf32>
    %39 = arith.mulf %37, %38 : vector<32x256xf32>
    %40 = arith.addf %36, %39 : vector<32x256xf32>
    %c0_20 = arith.constant 0 : index
    %c144 = arith.constant 144 : index
    %41 = vector.load %arg7[%c0_20, %c144] : memref<32x512xf32, #tpu.memory_space<vmem>>, vector<32x256xf32>
    %42 = vector.broadcast %11 : vector<32x1xf32> to vector<32x256xf32>
    %43 = arith.mulf %41, %42 : vector<32x256xf32>
    %44 = arith.addf %40, %43 : vector<32x256xf32>
    %45 = arith.addf %33, %44 : vector<32x256xf32>
    %c0_21 = arith.constant 0 : index
    %c113 = arith.constant 113 : index
    %46 = vector.load %arg7[%c0_21, %c113] : memref<32x512xf32, #tpu.memory_space<vmem>>, vector<32x256xf32>
    %47 = vector.broadcast %6 : vector<32x1xf32> to vector<32x256xf32>
    %48 = arith.mulf %46, %47 : vector<32x256xf32>
    %c0_22 = arith.constant 0 : index
    %c129 = arith.constant 129 : index
    %49 = vector.load %arg7[%c0_22, %c129] : memref<32x512xf32, #tpu.memory_space<vmem>>, vector<32x256xf32>
    %50 = vector.broadcast %9 : vector<32x1xf32> to vector<32x256xf32>
    %51 = arith.mulf %49, %50 : vector<32x256xf32>
    %52 = arith.addf %48, %51 : vector<32x256xf32>
    %c0_23 = arith.constant 0 : index
    %c145 = arith.constant 145 : index
    %53 = vector.load %arg7[%c0_23, %c145] : memref<32x512xf32, #tpu.memory_space<vmem>>, vector<32x256xf32>
    %54 = vector.broadcast %12 : vector<32x1xf32> to vector<32x256xf32>
    %55 = arith.mulf %53, %54 : vector<32x256xf32>
    %56 = arith.addf %52, %55 : vector<32x256xf32>
    %57 = vector.broadcast %20 : vector<1x256xf32> to vector<32x256xf32>
    %58 = arith.mulf %56, %57 : vector<32x256xf32>
    %59 = arith.addf %45, %58 : vector<32x256xf32>
    %c0_24 = arith.constant 0 : index
    %c0_25 = arith.constant 0 : index
    %c0_26 = arith.constant 0 : index
    %60 = vector.load %arg6[%c0_24, %c0_25, %c0_26] : memref<1x32x256xf32, #tpu.memory_space<vmem>>, vector<1x32x256xf32>
    %61 = vector.shape_cast %60 : vector<1x32x256xf32> to vector<32x256xf32>
    %62 = vector.shape_cast %59 : vector<32x256xf32> to vector<1x32x256xf32>
    tpu.vector_store %arg6[%c0_24, %c0_25, %c0_26], %62 {strides = array<i32>} : memref<1x32x256xf32, #tpu.memory_space<vmem>>, vector<1x32x256xf32>,
    return
  }
  func.func @transform_0(%arg0: i32, %arg1: i32) -> (i32, i32, i32) {
    %c0_i32 = arith.constant 0 : i32
    %c0_i32_0 = arith.constant 0 : i32
    return %arg0, %arg1, %c0_i32 : i32, i32, i32
  }
  func.func @transform_1(%arg0: i32, %arg1: i32) -> (i32, i32, i32) {
    %c0_i32 = arith.constant 0 : i32
    %c0_i32_0 = arith.constant 0 : i32
    return %arg0, %arg1, %c0_i32 : i32, i32, i32
  }
  func.func @transform_2(%arg0: i32, %arg1: i32) -> (i32, i32) {
    %c0_i32 = arith.constant 0 : i32
    %c0_i32_0 = arith.constant 0 : i32
    %c0_i32_1 = arith.constant 0 : i32
    return %c0_i32, %c0_i32_0 : i32, i32
  }
  func.func @transform_3(%arg0: i32, %arg1: i32) -> (i32, i32) {
    %c0_i32 = arith.constant 0 : i32
    %c0_i32_0 = arith.constant 0 : i32
    return %arg1, %c0_i32 : i32, i32
  }
  func.func @transform_4(%arg0: i32, %arg1: i32) -> (i32, i32, i32) {
    %c0_i32 = arith.constant 0 : i32
    %c0_i32_0 = arith.constant 0 : i32
    return %arg0, %arg1, %c0_i32 : i32, i32, i32
  }
}

</mosaic_0001>

<bundles_post_ra>
// kernel: tpu_custom_call.1
= control target key start
LH: loop header
LB: loop body
LE: loop exit
PB: predicated region body
PF: predicated region fallthrough
CT: control target
= control target key end

     0   :  { %9 = vsyncpa [#allocation4], 0  ;;  %s2610_s0 = inlined_call_operand.hbm [shape: f32[2,32,256], index: 0, kind: input, shape index: {}]   ;;  %s2611_s1 = inlined_call_operand.hbm [shape: f32[2,32,256], index: 1, kind: input, shape index: {}]   ;;  %s2612_s2 = inlined_call_operand.vmem [shape: f32[2,256], index: 2, kind: input, shape index: {}]   ;;  %s2613_s3 = inlined_call_operand.vmem [shape: f32[32,9], index: 3, kind: input, shape index: {}]   ;;  %s2614_s4 = inlined_call_operand.hbm [shape: f32[2,32,256], index: 4, kind: output, shape index: {}]  }
   0x1   :  { %11 = vsyncpa [#allocation4 + $0x1], 0 }
   0x2   :  { %12 = vsyncpa [#allocation7], 0 }
   0x3   :  { %14 = vsyncpa [#allocation7 + $0x1], 0 }
   0x4   :  { %15 = vsyncpa [#allocation5], 0 }
   0x5   :  { %17 = vsyncpa [#allocation5 + $0x1], 0  ;;  %s1753_s15 = smov 0   ;;  %s1755_s16 = smov 0  }
   0x6   :  { %s1757_s17 = smov 0   ;;  %s1759_s18 = smov 0  }
   0x7   :  { %s1761_s19 = smov 0   ;;  %s1763_s20 = smov 0  }
   0x8 LB: > { %s1426_s21 = sadd.s32 4294967295, %s1703_s20   ;;  %s1427_s22 = sadd.s32 4294967294, %s1703_s20   ;;  %s1703_s20 = sphi %s1763_s20, %s23_s20   ;;  %s1699_s19 = sphi %s1761_s19, %s2673_s19   ;;  %s1695_s18 = sphi %s1759_s18, %s2672_s18   ;;  %s1691_s17 = sphi %s1757_s17, %s2671_s17   ;;  %s1687_s16 = sphi %s1755_s16, %s2670_s16   ;;  %s1683_s15 = sphi %s1753_s15, %s2669_s15  }
   0x9   : > { %s35_s23 = sadd.s32 1, %s1699_s19  ;;  %s44_s24 = sadd.s32 1, %s1691_s17 }
   0xa   : > { %p37_p0 = scmp.ge.s32.totalorder %s35_s23, 2  ;;  %p51_p1 = scmp.ne.s32.totalorder %s1691_s17, %s1687_s16 }
   0xb   : > { %p52_p2 = scmp.eq.s32.totalorder %s1703_s20, 0  ;;  %p57_p3 = scmp.ne.s32.totalorder %s1687_s16, %s1683_s15 }
   0xc   : > { %s2675_s23 = smov (%p37_p0, %s35_s23), 0  ;;  %p58_p5 = scmp.eq.s32.totalorder %s1426_s21, 0 }
   0xd   : > { %p1794_p4 = por %p52_p2, %p51_p1  ;;  %s39_s26 = ssub.s32 %s1699_s19, %s2675_s23 }
   0xe   : > { %p158_p6 = scmp.eq.s32.totalorder %s1426_s21, 1  ;;  %p42_p7 = scmp.eq.s32.totalorder %s39_s26, 0 }
   0xf   : > { %p1800_p8 = por %p58_p5, %p57_p3  ;;  %p164_p10 = scmp.eq.s32.totalorder %s1427_s22, 1 }
  0x10   : > { %p1804_p9 = por %p158_p6, %p51_p1  ;;  %p1467_p13 = scmp.lt.s32.totalorder %s1703_s20, 2 }
  0x11   : > { %s2626_s27 = scalar_select %p1800_p8, 1, 0 }
  0x12   : > { %s2627_s28 = scalar_select %p1804_p9, 1, 0 }
  0x13   : > { %s1809_s29 = scalar_select %p42_p7, %s1691_s17, %s44_s24  }
  0x14   : > { %p1811_p11 = por %p164_p10, %p57_p3  ;;  %s1818_s5 = sand.u32 1, %s1691_s17  }
  0x15   : > { %s1431_s6 = sshll.u32 %s1818_s5, 6  ;;  %s1447_s7 = sshll.u32 %s1699_s19, 10 }
  0x16   : > { %s2628_s30 = scalar_select %p1811_p11, 1, 0 }
  0x17   : > { %s1827_s10 = scalar_lea.hbm %s2610_s0, %s1447_s7  ;;  %s200_s11 = scalar_lea.vmem [#allocation3], %s1431_s6 }
  0x18   : > { %s210_s12 = sshll.u32 %s200_s11, 4  ;;  %p1835_p0 = pnand %p1467_p13, %p1794_p4  ;;  %s1831_s12 = int_to_ptr.vmem [resolvable:$true] %s210_s12 }
  0x19   : > { %s197_s14 = scalar_lea.sflag [#allocation4], %s1818_s5  ;;  %s1557_s21 = scalar_lea.hbm %s1827_s10, 1024 }
  0x1a   : > { %p1558_p2 = scmp.ne.s32.totalorder %s1827_s10, %s1557_s21  ;;  %p1559_p3 = pneg %p1835_p0 }
  0x1b   : > { %s1562_s25 = scalar_lea.hbm %s2610_s0, 2048  ;;  %p1563_p4 = scmp.lt.u32.totalorder %s1827_s10, %s2610_s0 }
  0x1c   : > { %p1560_p5 = pnand %p1559_p3, %p1558_p2  ;;  %p1564_p7 = scmp.lt.u32.totalorder %s1562_s25, %s1557_s21 }
  0x1d   : > { %p1566_p13 = scmp.lt.u32.totalorder %s1557_s21, %s1827_s10 }
  0x1e   : > { %p1561_p6 = pneg %p1560_p5  ;;  %p1565_p10 = por %p1564_p7, %p1563_p4 }
  0x20   : > { %p1567_p12 = por %p1566_p13, %p1565_p10 }
  0x22   : > { %p1568_p1 = pnand %p1567_p12, %p1561_p6 }
  0x24   : > { %1571 = shalt.err (!%p1568_p1)
}
  0x25   : > { %s1572_s9 = scalar_lea.vmem %s1831_s12, 1024  ;;  %s1705_s11 = smov [#allocation3]  }
  0x26   : > { %p1573_p2 = scmp.ne.s32.totalorder %s1831_s12, %s1572_s9  ;;  %s1577_s22 = sshll.u32 %s1705_s11, 4  ;;  %s1578_s22 = int_to_ptr.vmem [resolvable:$false] %s1577_s22 }
  0x27   : > { %s1579_s24 = scalar_lea.vmem %s1578_s22, 2048  ;;  %p1580_p9 = scmp.lt.s32.totalorder %s1831_s12, %s1578_s22 }
  0x28   : > { %p1575_p5 = pnand %p1573_p2, %p1559_p3  ;;  %p1581_p4 = scmp.lt.s32.totalorder %s1579_s24, %s1572_s9 }
  0x2a   : > { %p1576_p11 = pneg %p1575_p5  ;;  %p1582_p7 = por %p1581_p4, %p1580_p9 }
  0x2c   : > { %p1583_p10 = pnand %p1582_p7, %p1576_p11 }
  0x2e   : > { %1586 = shalt.err (!%p1583_p10)
}
  0x2f   : > { %s2616_s21 = smov 256   ;;  %s1707_s25 = smov 16  }
  0x30   : > { %1459 = dma.hbm_to_vmem [thread:$0]  (!%p1835_p0), %s1827_s10, 1024, %s1831_s12, %s197_s14, %s2616_s21, %s2616_s21, %s1707_s25  }
  0x31   : > { %p242_p9 = scmp.lt.s32.totalorder %s1703_s20, 3  ;;  %s1877_s9 = scalar_lea.hbm %s2611_s1, %s1447_s7 }
  0x32   : > { %p2630_p11 = scmp.ge.s32.totalorder %s1703_s20, 1  ;;  %s224_s22 = scalar_lea.vmem [#allocation6], %s1431_s6 }
  0x33   : > { %s234_s24 = sshll.u32 %s224_s22, 4  ;;  %s221_s10 = scalar_lea.sflag [#allocation7], %s1818_s5  ;;  %s1887_s24 = int_to_ptr.vmem [resolvable:$true] %s234_s24 }
  0x34   : > { %p1881_p12 = pnand %p2630_p11, %p242_p9  ;;  %s1587_s12 = scalar_lea.hbm %s1877_s9, 1024 }
  0x35   : > { %p1588_p1 = scmp.ne.s32.totalorder %s1877_s9, %s1587_s12  ;;  %s1592_s26 = scalar_lea.hbm %s2611_s1, 2048 }
  0x36   : > { %p1593_p2 = scmp.lt.u32.totalorder %s1877_s9, %s2611_s1  ;;  %p1594_p5 = scmp.lt.u32.totalorder %s1592_s26, %s1587_s12 }
  0x37   : > { %p1590_p6 = pnand %p1588_p1, %p1559_p3  ;;  %p1596_p7 = scmp.lt.u32.totalorder %s1587_s12, %s1877_s9 }
  0x38   : > { %p1595_p4 = por %p1594_p5, %p1593_p2 }
  0x39   : > { %p1591_p13 = pneg %p1590_p6 }
  0x3a   : > { %p1597_p10 = por %p1596_p7, %p1595_p4 }
  0x3c   : > { %p1598_p9 = pnand %p1597_p10, %p1591_p13 }
  0x3e   : > { %1601 = shalt.err (!%p1598_p9)
}
  0x3f   : > { %s1602_s6 = scalar_lea.vmem %s1887_s24, 1024  ;;  %s1708_s22 = smov [#allocation6]  }
  0x40   : > { %p1603_p11 = scmp.ne.s32.totalorder %s1887_s24, %s1602_s6  ;;  %s1607_s7 = sshll.u32 %s1708_s22, 4  ;;  %s1608_s7 = int_to_ptr.vmem [resolvable:$false] %s1607_s7 }
  0x41   : > { %s1609_s21 = scalar_lea.vmem %s1608_s7, 2048  ;;  %p1610_p8 = scmp.lt.s32.totalorder %s1887_s24, %s1608_s7 }
  0x42   : > { %p1605_p1 = pnand %p1603_p11, %p1559_p3  ;;  %p1611_p2 = scmp.lt.s32.totalorder %s1609_s21, %s1602_s6 }
  0x44   : > { %p1606_p6 = pneg %p1605_p1  ;;  %p1612_p5 = por %p1611_p2, %p1610_p8 }
  0x46   : > { %p1613_p4 = pnand %p1612_p5, %p1606_p6 }
  0x48   : > { %1616 = shalt.err (!%p1613_p4)
}
  0x49   : > { %s2632_s12 = smov 256   ;;  %246 = sbr.rel (%p1881_p12) target bundleno = 777 (0x309), region = 36 }
  0x4a   : > { %1462 = dma.hbm_to_vmem [thread:$0]  (!%p1835_p0), %s1877_s9, 1024, %s1887_s24, %s221_s10, %s2632_s12, %s2632_s12, %s1707_s25  }
  0x50   : > { %s1921_s14 = sand.u32 1, %s1687_s16   ;;  %p2633_p8 = scmp.ne.s32.totalorder %s2626_s27, 0 }
  0x51   : > { %s1924_s26 = sshll.u32 %s1921_s14, 6  ;;  %s249_s13 = scalar_lea.sflag [#allocation4], %s1921_s14 }
  0x52   : > { %s1928_s8 = scalar_lea.vmem [#allocation3], %s1924_s26 }
  0x53   : > { %1670 = dma.done.wait (%p2633_p8), %s249_s13, 1024  }
  0x54   : > { %1672 = vsyncadd (%p2633_p8), %s249_s13, 4294966272  ;;  %s258_s5 = scalar_lea.sflag [#allocation7], %s1921_s14  ;;  %s1936_s25 = scalar_lea.vmem [#allocation6], %s1924_s26 }
  0x55   : > { %1674 = dma.done.wait (%p2633_p8), %s258_s5, 1024  }
  0x56   : > { %1676 = vsyncadd (%p2633_p8), %s258_s5, 4294966272  ;;  %v1709_v0 = vmov 0   ;;  %v1945_v1 = vld [vmem:[%s2613_s3] sm:$0xff]  ;;  %v1950_v2 = vld [vmem:[%s2613_s3 + $0x10] sm:$0xff]  ;;  %v1710_v5 = vmov 3   ;;  %v603_v6 = vlaneseq  ;;  %v1711_v9 = vmov 6  }
  0x57   : > { %1537 = vset.pattern.permute.xlu0 %v1709_v0  ;;  %1538 = vset.pattern.permute.xlu1 %v1709_v0  ;;  %v1957_v3 = vld [vmem:[%s2613_s3 + $0x8] sm:$0xff]  ;;  %v1962_v4 = vld [vmem:[%s2613_s3 + $0x18] sm:$0xff]  ;;  %v349_v10 = vld [vmem:[%s2612_s2] ss:$2 sm:$0x3]  ;;  %s1712_s13 = smov 111  }
  0x58   : > { %366 = vperm.xlu0 %1537, %v1945_v1   ;;  %376 = vperm.xlu1 %1538, %v1950_v2   ;;  %v1968_v7 = vshrl.u32 %v603_v6, 7  ;;  %v1713_v13 = vmov 4   ;;  %v1714_v15 = vmov 5   ;;  %v1715_v16 = vmov 1   ;;  %v317_v24 = vld [vmem:[%s1928_s8] sm:$0xff]  ;;  %v318_v29 = vld [vmem:[%s1928_s8 + $0x8] sm:$0xff] }
  0x59   : > { %v1716_v17 = vmov 7   ;;  %v1717_v18 = vmov 8   ;;  %v1718_v19 = vmov 2   ;;  %v325_v25 = vld [vmem:[%s1936_s25] sm:$0xff]  ;;  %v326_v30 = vld [vmem:[%s1936_s25 + $0x8] sm:$0xff]  ;;  %v319_v31 = vld [vmem:[%s1928_s8 + $0x10] sm:$0xff] }
  0x5a   : > { %v605_v8 = vsub.s32 0, %v1968_v7  ;;  %v609_v12 = vsub.s32 1, %v1968_v7  ;;  %v2019_v26 = vadd.f32 %v325_v25, %v317_v24  ;;  %v327_v34 = vld [vmem:[%s1936_s25 + $0x10] sm:$0xff]  ;;  %v320_v35 = vld [vmem:[%s1928_s8 + $0x18] sm:$0xff]  ;;  %s1719_s5 = smov 112   ;;  %v2030_v38 = vadd.f32 %v326_v30, %v318_v29  ;;  %v321_v44 = vld [vmem:[%s1928_s8 + $0x20] sm:$0xff] }
  0x5b   : > { %v328_v36 = vld [vmem:[%s1936_s25 + $0x18] sm:$0xff]  ;;  %v2032_v39 = vadd.f32 %v327_v34, %v319_v31  ;;  %v329_v45 = vld [vmem:[%s1936_s25 + $0x20] sm:$0xff]  ;;  %v322_v48 = vld [vmem:[%s1928_s8 + $0x28] sm:$0xff]  ;;  %vm460_vm0 = vcmask 916480   ;;  %vm569_vm1 = vcmask 785408   ;;  %s1721_s11 = smov 113  }
  0x5c   : > { %371 = vperm.xlu0 %1537, %v1957_v3   ;;  %381 = vperm.xlu1 %1538, %v1962_v4   ;;  %v606_v11 = vrot.slane %v349_v10, %v605_v8  ;;  %v610_v14 = vrot.slane %v349_v10, %v609_v12  ;;  %v2035_v41 = vadd.f32 %v328_v36, %v320_v35  ;;  %v330_v49 = vld [vmem:[%s1936_s25 + $0x28] sm:$0xff]  ;;  %v323_v54 = vld [vmem:[%s1928_s8 + $0x30] sm:$0xff]  ;;  %v324_v56 = vld [vmem:[%s1928_s8 + $0x38] sm:$0xff]  ;;  %s1720_s8 = smov 96   ;;  %s1722_s24 = smov 127   ;;  %vm1134_vm2 = vcmask 924672  }
  0x5d   : > { %v2043_v47 = vadd.f32 %v329_v45, %v321_v44  ;;  %v2052_v53 = vadd.f32 %v330_v49, %v322_v48  ;;  %v331_v55 = vld [vmem:[%s1936_s25 + $0x30] sm:$0xff]  ;;  %v332_v57 = vld [vmem:[%s1936_s25 + $0x38] sm:$0xff]  ;;  %s1723_s10 = smov 126   ;;  %vm615_vm3 = vcmask 908288   ;;  %s1724_s6 = smov 17   ;;  %vm868_vm4 = vcmask 1039360  }
  0x5e   : > { %v2061_v61 = vadd.f32 %v331_v55, %v323_v54  ;;  %v2063_v62 = vadd.f32 %v332_v57, %v324_v56  ;;  %vm1187_vm5 = vcmask 1031168   ;;  %vm1256_vm6 = vcmask 138240   ;;  %s295_s27 = scalar_lea.vmem [#allocation8], %s1924_s26  ;;  %s1449_s22 = sshll.u32 %s1695_s18, 10 }
  0x5f   : > { %s1298_s26 = sshll.u32 %s295_s27, 4  ;;  %s2559_s12 = scalar_lea.hbm %s2614_s4, %s1449_s22  ;;  %s2554_s26 = int_to_ptr.vmem [resolvable:$true] %s1298_s26 }
  0x60   : > { %1539 = vset.pattern.permute.xlu0 %v1710_v5  ;;  %1540 = vset.pattern.permute.xlu1 %v1710_v5  ;;  %s1282_s18 = scalar_lea.sflag [#allocation5], %s1921_s14  ;;  %p2666_p3 = scmp.ne.s32.totalorder %s2627_s28, 0 }
  0x61   : > { %397 = vperm.xlu0 %1539, %v1945_v1   ;;  %401 = vperm.xlu1 %1540, %v1957_v3  }
  0x65   : > { %409 = vperm.xlu0 %1539, %v1962_v4   ;;  %405 = vperm.xlu1 %1540, %v1950_v2  }
  0x69   : > { %1541 = vset.pattern.permute.xlu1 %v1711_v9  ;;  %1542 = vset.pattern.permute.xlu0 %v1711_v9 }
  0x6a   : > { %506 = vperm.xlu1 %1541, %v1945_v1   ;;  %510 = vperm.xlu0 %1542, %v1957_v3  }
  0x6e   : > { %514 = vperm.xlu1 %1541, %v1950_v2   ;;  %611 = vrot.lane.b32.xlu0 %v606_v11, %s1712_s13 }
  0x6f   : > { %1545 = vset.pattern.permute.xlu0 %v1713_v13 }
  0x72   : > { %518 = vperm.xlu1 %1541, %v1962_v4   ;;  %665 = vperm.xlu0 %1545, %v1957_v3  }
  0x76   : > { %613 = vrot.lane.b32.xlu1 %v610_v14, %s1712_s13  ;;  %1546 = vset.pattern.permute.xlu0 %v1714_v15  ;;  %s1617_s13 = scalar_lea.vmem %s2554_s26, 1024 }
  0x77   : > { %1543 = vset.pattern.permute.xlu1 %v1715_v16  ;;  %930 = vperm.xlu0 %1546, %v1945_v1   ;;  %p1618_p0 = scmp.ne.s32.totalorder %s2554_s26, %s1617_s13 }
  0x79   : > { %p1619_p12 = pnand %p1618_p0, %p2666_p3 }
  0x7a   : > { %637 = vperm.xlu1 %1543, %v1957_v3  }
  0x7b   : > { %942 = vperm.xlu0 %1546, %v1962_v4   ;;  %p1620_p13 = pneg %p1619_p12 }
  0x7e   : > { %1544 = vset.pattern.permute.xlu1 %v1713_v13 }
  0x7f   : > { %661 = vperm.xlu1 %1544, %v1945_v1   ;;  %1549 = vset.pattern.permute.xlu0 %v1716_v17 }
  0x80   : > { %741 = vperm.xlu0 %1549, %v1957_v3  }
  0x83   : > { %669 = vperm.xlu1 %1544, %v1950_v2  }
  0x84   : > { %1550 = vset.pattern.permute.xlu0 %v1717_v18 }
  0x85   : > { %1026 = vperm.xlu0 %1550, %v1945_v1  }
  0x87   : > { %673 = vperm.xlu1 %1544, %v1962_v4  }
  0x89   : > { %1038 = vperm.xlu0 %1550, %v1962_v4  }
  0x8b   : > { %1547 = vset.pattern.permute.xlu1 %v1714_v15 }
  0x8c   : > { %934 = vperm.xlu1 %1547, %v1957_v3  }
  0x8d   : > { %1552 = vset.pattern.permute.xlu0 %v1715_v16 }
  0x8e   : > { %633 = vperm.xlu0 %1552, %v1945_v1  }
  0x90   : > { %938 = vperm.xlu1 %1547, %v1950_v2  }
  0x92   : > { %645 = vperm.xlu0 %1552, %v1962_v4  }
  0x94   : > { %1548 = vset.pattern.permute.xlu1 %v1716_v17 }
  0x95   : > { %737 = vperm.xlu1 %1548, %v1945_v1  }
  0x96   : > { %1555 = vset.pattern.permute.xlu0 %v1718_v19 }
  0x99   : > { %745 = vperm.xlu1 %1548, %v1950_v2  }
  0x9d   : > { %749 = vperm.xlu1 %1548, %v1962_v4  }
  0xa1   : > { %1551 = vset.pattern.permute.xlu1 %v1717_v18 }
  0xa2   : > { %1030 = vperm.xlu1 %1551, %v1957_v3  }
  0xa6   : > { %1034 = vperm.xlu1 %1551, %v1950_v2  }
  0xaa   : > { %1553 = vset.pattern.permute.xlu1 %v1715_v16 }
  0xab   : > { %641 = vperm.xlu1 %1553, %v1950_v2  }
  0xaf   : > { %1554 = vset.pattern.permute.xlu1 %v1718_v19 }
  0xb0   : > { %902 = vperm.xlu1 %1554, %v1945_v1  }
  0xb4   : > { %906 = vperm.xlu1 %1554, %v1957_v3  }
  0xd7   : > { %v2009_v20 = vpop.permute.xlu0 %366  ;;  %v2011_v21 = vpop.permute.xlu1 %376 }
  0xd8   : > { %2634 = vst [vmem:[#allocation12_spill] sm:$0xff] %v2011_v21 }
  0xdb   : > { %v2013_v22 = vpop.permute.xlu0 %371  ;;  %v2015_v23 = vpop.permute.xlu1 %381 }
  0xe0   : > { %v398_v27 = vpop.permute.xlu0 %397  ;;  %v402_v28 = vpop.permute.xlu1 %401 }
  0xe1   : > { %v413_v32 = vmul.f32 %v398_v27, %v2019_v26  ;;  %v412_v33 = vmul.f32 0.0, %v398_v27  ;;  %v415_v37 = vmul.f32 0.0, %v402_v28  ;;  %v414_v40 = vmul.f32 %v398_v27, %v2030_v38 }
  0xe2   : > { %v417_v42 = vmul.f32 %v402_v28, %v2035_v41  ;;  %v416_v43 = vmul.f32 %v402_v28, %v2032_v39 }
  0xe3   : > { %438 = vrot.lane.b32.xlu0 %v413_v32, %s1719_s5  ;;  %436 = vrot.lane.b32.xlu1 %v412_v33, %s1719_s5 }
  0xe4   : > { %v406_v46 = vpop.permute.xlu1 %405  ;;  %v410_v52 = vpop.permute.xlu0 %409 }
  0xe5   : > { %v419_v50 = vmul.f32 %v406_v46, %v2043_v47  ;;  %v418_v51 = vmul.f32 0.0, %v406_v46  ;;  %v420_v59 = vmul.f32 %v406_v46, %v2052_v53  ;;  %v421_v60 = vmul.f32 0.0, %v410_v52 }
  0xe6   : > { %v422_v63 = vmul.f32 %v410_v52, %v2061_v61  ;;  %v423_v0 = vmul.f32 %v410_v52, %v2063_v62 }
  0xe7   : > { %442 = vrot.lane.b32.xlu0 %v415_v37, %s1719_s5  ;;  %440 = vrot.lane.b32.xlu1 %v414_v40, %s1719_s5 }
  0xe9   : > { %v507_v58 = vpop.permute.xlu1 %506  ;;  %v511_v6 = vpop.permute.xlu0 %510 }
  0xea   : > { %v522_v3 = vmul.f32 %v507_v58, %v2030_v38  ;;  %v521_v5 = vmul.f32 %v507_v58, %v2019_v26  ;;  %v524_v9 = vmul.f32 %v511_v6, %v2032_v39  ;;  %v523_v11 = vmul.f32 0.0, %v507_v58 }
  0xeb   : > { %446 = vrot.lane.b32.xlu0 %v417_v42, %s1719_s5  ;;  %444 = vrot.lane.b32.xlu1 %v416_v43, %s1719_s5  ;;  %v525_v13 = vmul.f32 %v511_v6, %v2035_v41  ;;  %v526_v14 = vmul.f32 0.0, %v511_v6 }
  0xed   : > { %v515_v1 = vpop.permute.xlu1 %514  ;;  %v2093_v29 = vpop.permute.xlu0 %611 }
  0xee   : > { %v527_v16 = vmul.f32 %v515_v1, %v2043_v47  ;;  %v528_v17 = vmul.f32 %v515_v1, %v2052_v53  ;;  %v529_v24 = vmul.f32 0.0, %v515_v1  ;;  %2635 = vst [vmem:[#allocation13_spill] sm:$0xff] %v2093_v29 }
  0xef   : > { %450 = vrot.lane.b32.xlu0 %v419_v50, %s1719_s5  ;;  %448 = vrot.lane.b32.xlu1 %v418_v51, %s1719_s5 }
  0xf1   : > { %v519_v10 = vpop.permute.xlu1 %518  ;;  %v666_v34 = vpop.permute.xlu0 %665 }
  0xf2   : > { %v530_v25 = vmul.f32 %v519_v10, %v2061_v61  ;;  %v531_v27 = vmul.f32 %v519_v10, %v2063_v62  ;;  %v532_v30 = vmul.f32 0.0, %v519_v10  ;;  %v678_v35 = vmul.f32 %v666_v34, %v2032_v39 }
  0xf3   : > { %452 = vrot.lane.b32.xlu1 %v420_v59, %s1719_s5  ;;  %454 = vrot.lane.b32.xlu0 %v421_v60, %s1719_s5 }
  0xf5   : > { %v2077_v15 = vpop.permute.xlu1 %613 }
  0xf6   : > { %v931_v45 = vpop.permute.xlu0 %930 }
  0xf7   : > { %456 = vrot.lane.b32.xlu1 %v422_v63, %s1719_s5  ;;  %458 = vrot.lane.b32.xlu0 %v423_v0, %s1719_s5  ;;  %v945_v46 = vmul.f32 %v931_v45, %v2019_v26  ;;  %v947_v50 = vmul.f32 0.0, %v931_v45 }
  0xf9   : > { %v2085_v19 = vpop.permute.xlu1 %637 }
  0xfa   : > { %v943_v58 = vpop.permute.xlu0 %942 }
  0xfb   : > { %547 = vrot.lane.b32.xlu1 %v522_v3, %s1720_s8  ;;  %545 = vrot.lane.b32.xlu0 %v521_v5, %s1720_s8  ;;  %v954_v60 = vmul.f32 %v943_v58, %v2061_v61  ;;  %v955_v1 = vmul.f32 %v943_v58, %v2063_v62  ;;  %v956_v3 = vmul.f32 0.0, %v943_v58 }
  0xfe   : > { %v662_v28 = vpop.permute.xlu1 %661 }
  0xff   : > { %549 = vrot.lane.b32.xlu0 %v523_v11, %s1720_s8  ;;  %551 = vrot.lane.b32.xlu1 %v524_v9, %s1720_s8  ;;  %v676_v32 = vmul.f32 %v662_v28, %v2019_v26  ;;  %v677_v33 = vmul.f32 %v662_v28, %v2030_v38  ;;  %v742_v63 = vpop.permute.xlu0 %741 }
 0x102   : > { %v670_v31 = vpop.permute.xlu1 %669 }
 0x103   : > { %553 = vrot.lane.b32.xlu0 %v525_v13, %s1720_s8  ;;  %555 = vrot.lane.b32.xlu1 %v526_v14, %s1720_s8  ;;  %v681_v37 = vmul.f32 %v670_v31, %v2052_v53  ;;  %v755_v13 = vmul.f32 %v742_v63, %v2032_v39  ;;  %v756_v14 = vmul.f32 %v742_v63, %v2035_v41 }
 0x104   : > { %v1027_v10 = vpop.permute.xlu0 %1026 }
 0x106   : > { %v674_v36 = vpop.permute.xlu1 %673 }
 0x107   : > { %557 = vrot.lane.b32.xlu0 %v527_v16, %s1720_s8  ;;  %559 = vrot.lane.b32.xlu1 %v528_v17, %s1720_s8  ;;  %v682_v42 = vmul.f32 %v674_v36, %v2061_v61  ;;  %v683_v43 = vmul.f32 %v674_v36, %v2063_v62  ;;  %v757_v16 = vmul.f32 0.0, %v742_v63  ;;  %v1041_v36 = vmul.f32 %v1027_v10, %v2019_v26 }
 0x10b   : > { %561 = vrot.lane.b32.xlu0 %v529_v24, %s1720_s8  ;;  %563 = vrot.lane.b32.xlu1 %v530_v25, %s1720_s8  ;;  %v935_v40 = vpop.permute.xlu1 %934  ;;  %v1039_v24 = vpop.permute.xlu0 %1038 }
 0x10c   : > { %v948_v49 = vmul.f32 %v935_v40, %v2032_v39  ;;  %v950_v51 = vmul.f32 0.0, %v935_v40  ;;  %v949_v52 = vmul.f32 %v935_v40, %v2035_v41  ;;  %v1050_v58 = vmul.f32 %v1039_v24, %v2061_v61 }
 0x10f   : > { %565 = vrot.lane.b32.xlu0 %v531_v27, %s1720_s8  ;;  %914 = vperm.xlu1 %1554, %v1962_v4   ;;  %v679_v4 = vmul.f32 %v666_v34, %v2035_v41  ;;  %v939_v44 = vpop.permute.xlu1 %938 }
 0x110   : > { %v952_v55 = vmul.f32 %v939_v44, %v2052_v53  ;;  %v951_v56 = vmul.f32 %v939_v44, %v2043_v47  ;;  %v953_v59 = vmul.f32 0.0, %v939_v44 }
 0x113   : > { %910 = vperm.xlu0 %1555, %v1950_v2   ;;  %567 = vrot.lane.b32.xlu1 %v532_v30, %s1720_s8  ;;  %v680_v2 = vmul.f32 %v670_v31, %v2043_v47  ;;  %v2150_v30 = vpop.permute.xlu0 %633 }
 0x114   : > { %v738_v48 = vpop.permute.xlu1 %737 }
 0x115   : > { %v752_v5 = vmul.f32 %v738_v48, %v2019_v26  ;;  %v753_v6 = vmul.f32 %v738_v48, %v2030_v38  ;;  %v754_v11 = vmul.f32 0.0, %v738_v48 }
 0x117   : > { %694 = vrot.lane.b32.xlu0 %v677_v33, %s1719_s5  ;;  %692 = vrot.lane.b32.xlu1 %v676_v32, %s1719_s5  ;;  %v2159_v34 = vpop.permute.xlu0 %645 }
 0x118   : > { %1556 = vset.pattern.permute.xlu0 %v1717_v18  ;;  %v946_v18 = vmul.f32 %v931_v45, %v2030_v38  ;;  %v746_v54 = vpop.permute.xlu1 %745 }
 0x119   : > { %v758_v25 = vmul.f32 %v746_v54, %v2043_v47  ;;  %v759_v27 = vmul.f32 %v746_v54, %v2052_v53  ;;  %v760_v31 = vmul.f32 0.0, %v746_v54 }
 0x11b   : > { %698 = vrot.lane.b32.xlu0 %v679_v4, %s1719_s5  ;;  %696 = vrot.lane.b32.xlu1 %v678_v35, %s1719_s5 }
 0x11c   : > { %v750_v57 = vpop.permute.xlu1 %749 }
 0x11d   : > { %v761_v32 = vmul.f32 %v750_v57, %v2061_v61  ;;  %v762_v35 = vmul.f32 %v750_v57, %v2063_v62  ;;  %v763_v4 = vmul.f32 0.0, %v750_v57 }
 0x11f   : > { %702 = vrot.lane.b32.xlu0 %v681_v37, %s1719_s5  ;;  %700 = vrot.lane.b32.xlu1 %v680_v2, %s1719_s5  ;;  %v1042_v2 = vmul.f32 %v1027_v10, %v2030_v38 }
 0x121   : > { %v1031_v0 = vpop.permute.xlu1 %1030 }
 0x122   : > { %v1044_v45 = vmul.f32 %v1031_v0, %v2032_v39 }
 0x123   : > { %706 = vrot.lane.b32.xlu0 %v683_v43, %s1719_s5  ;;  %704 = vrot.lane.b32.xlu1 %v682_v42, %s1719_s5  ;;  %v1043_v42 = vmul.f32 0.0, %v1027_v10 }
 0x125   : > { %v1035_v9 = vpop.permute.xlu1 %1034 }
 0x126   : > { %v1048_v54 = vmul.f32 %v1035_v9, %v2052_v53 }
 0x127   : > { %971 = vrot.lane.b32.xlu0 %v946_v18, %s1719_s5  ;;  %969 = vrot.lane.b32.xlu1 %v945_v46, %s1719_s5  ;;  %v1045_v18 = vmul.f32 %v1031_v0, %v2035_v41 }
 0x12a   : > { %v2142_v17 = vpop.permute.xlu1 %641 }
 0x12b   : > { %975 = vrot.lane.b32.xlu0 %v948_v49, %s1719_s5  ;;  %973 = vrot.lane.b32.xlu1 %v947_v50, %s1719_s5  ;;  %v1046_v49 = vmul.f32 0.0, %v1031_v0  ;;  %v1047_v50 = vmul.f32 %v1035_v9, %v2043_v47 }
 0x12f   : > { %979 = vrot.lane.b32.xlu0 %v950_v51, %s1719_s5  ;;  %977 = vrot.lane.b32.xlu1 %v949_v52, %s1719_s5  ;;  %v2148_v28 = vpop.permute.xlu1 %902 }
 0x133   : > { %983 = vrot.lane.b32.xlu0 %v952_v55, %s1719_s5  ;;  %981 = vrot.lane.b32.xlu1 %v951_v56, %s1719_s5  ;;  %v2157_v33 = vpop.permute.xlu1 %906  ;;  %v1049_v55 = vmul.f32 0.0, %v1035_v9 }
 0x137   : > { %985 = vrot.lane.b32.xlu1 %v953_v59, %s1719_s5  ;;  %987 = vrot.lane.b32.xlu0 %v954_v60, %s1719_s5  ;;  %v1441_v59 = vld [vmem:[%s2612_s2 + $0x1] ss:$2 sm:$0x3]  ;;  %v1051_v60 = vmul.f32 %v1039_v24, %v2063_v62 }
 0x13b   : > { %989 = vrot.lane.b32.xlu1 %v955_v1, %s1719_s5  ;;  %991 = vrot.lane.b32.xlu0 %v956_v3, %s1719_s5  ;;  %v1052_v1 = vmul.f32 0.0, %v1039_v24  ;;  %s1725_s5 = smov [#allocation8]  }
 0x13f   : > { %776 = vrot.lane.b32.xlu1 %v752_v5, %s1720_s8  ;;  %778 = vrot.lane.b32.xlu0 %v753_v6, %s1720_s8  ;;  %v1125_v5 = vrot.slane %v1441_v59, %v605_v8  ;;  %v1129_v6 = vrot.slane %v1441_v59, %v609_v12 }
 0x143   : > { %780 = vrot.lane.b32.xlu1 %v754_v11, %s1720_s8  ;;  %782 = vrot.lane.b32.xlu0 %v755_v13, %s1720_s8 }
 0x147   : > { %784 = vrot.lane.b32.xlu1 %v756_v14, %s1720_s8  ;;  %786 = vrot.lane.b32.xlu0 %v757_v16, %s1720_s8 }
 0x14b   : > { %788 = vrot.lane.b32.xlu1 %v758_v25, %s1720_s8  ;;  %790 = vrot.lane.b32.xlu0 %v759_v27, %s1720_s8 }
 0x14f   : > { %792 = vrot.lane.b32.xlu1 %v760_v31, %s1720_s8  ;;  %794 = vrot.lane.b32.xlu0 %v761_v32, %s1720_s8  ;;  %v393_v32 = vmul.f32 0.0, %v2015_v23 }
 0x153   : > { %796 = vrot.lane.b32.xlu1 %v762_v35, %s1720_s8  ;;  %798 = vrot.lane.b32.xlu0 %v763_v4, %s1720_s8 }
 0x155   : > { %v2166_v37 = vpop.permute.xlu1 %436  ;;  %v2168_v40 = vpop.permute.xlu0 %438 }
 0x156   : > { %2636 = vst [vmem:[#allocation14_spill] sm:$0xff] %v2166_v37 }
 0x157   : > { %1067 = vrot.lane.b32.xlu0 %v1042_v2, %s1720_s8  ;;  %1065 = vrot.lane.b32.xlu1 %v1041_v36, %s1720_s8 }
 0x159   : > { %v2172_v43 = vpop.permute.xlu1 %440  ;;  %v2174_v44 = vpop.permute.xlu0 %442 }
 0x15b   : > { %1071 = vrot.lane.b32.xlu0 %v1044_v45, %s1720_s8  ;;  %1069 = vrot.lane.b32.xlu1 %v1043_v42, %s1720_s8 }
 0x15d   : > { %v2180_v46 = vpop.permute.xlu1 %444  ;;  %v2182_v48 = vpop.permute.xlu0 %446 }
 0x15f   : > { %1075 = vrot.lane.b32.xlu0 %v1046_v49, %s1720_s8  ;;  %1073 = vrot.lane.b32.xlu1 %v1045_v18, %s1720_s8  ;;  %v394_v18 = vmul.f32 %v2015_v23, %v2061_v61 }
 0x161   : > { %v2187_v51 = vpop.permute.xlu1 %448  ;;  %v2189_v52 = vpop.permute.xlu0 %450 }
 0x162   : > { %2637 = vst [vmem:[#allocation15_spill] sm:$0xff] %v2187_v51  ;;  %2638 = vst [vmem:[#allocation16_spill] sm:$0xff] %v2189_v52 }
 0x163   : > { %1079 = vrot.lane.b32.xlu0 %v1048_v54, %s1720_s8  ;;  %1077 = vrot.lane.b32.xlu1 %v1047_v50, %s1720_s8 }
 0x165   : > { %v2194_v56 = vpop.permute.xlu1 %452  ;;  %v455_v57 = vpop.permute.xlu0 %454 }
 0x166   : > { %2639 = vst [vmem:[#allocation17_spill] sm:$0xff] %v2194_v56  ;;  %v659_v56 = vmul.f32 %v2159_v34, %v2063_v62 }
 0x167   : > { %1081 = vrot.lane.b32.xlu1 %v1049_v55, %s1720_s8  ;;  %1083 = vrot.lane.b32.xlu0 %v1050_v58, %s1720_s8  ;;  %v395_v58 = vmul.f32 %v2015_v23, %v2063_v62 }
 0x169   : > { %v457_v63 = vpop.permute.xlu1 %456  ;;  %v459_v0 = vpop.permute.xlu0 %458 }
 0x16a   : > { %v468_v3 = vsel %vm460_vm0, %v457_v63, %v459_v0  ;;  %v467_v25 = vsel %vm460_vm0, %v455_v57, %v457_v63  ;;  %v492_v59 = vadd.f32 %v459_v0, %v395_v58 }
 0x16b   : > { %1085 = vrot.lane.b32.xlu1 %v1051_v60, %s1720_s8  ;;  %1087 = vrot.lane.b32.xlu0 %v1052_v1, %s1720_s8  ;;  %v490_v4 = vadd.f32 %v467_v25, %v393_v32  ;;  %v491_v49 = vadd.f32 %v468_v3, %v394_v18  ;;  %s1621_s8 = sshll.u32 %s1725_s5, 4  ;;  %s1622_s8 = int_to_ptr.vmem [resolvable:$false] %s1621_s8 }
 0x16c   : > { %s1623_s25 = scalar_lea.vmem %s1622_s8, 2048  ;;  %p1624_p7 = scmp.lt.s32.totalorder %s2554_s26, %s1622_s8 }
 0x16d   : > { %v548_v9 = vpop.permute.xlu1 %547  ;;  %v2210_v10 = vpop.permute.xlu0 %545  ;;  %p1625_p10 = scmp.lt.s32.totalorder %s1623_s25, %s1617_s13 }
 0x16e   : > { %2640 = vst [vmem:[#allocation18_spill] sm:$0xff] %v2210_v10  ;;  %v2214_v11 = vsel %vm569_vm1, %v2210_v10, %v548_v9 }
 0x16f   : > { %2641 = vst [vmem:[#allocation19_spill] sm:$0xff] %v2214_v11  ;;  %1130 = vrot.lane.b32.xlu1 %v1125_v5, %s1721_s11  ;;  %1132 = vrot.lane.b32.xlu0 %v1129_v6, %s1721_s11  ;;  %p1626_p9 = por %p1625_p10, %p1624_p7 }
 0x171   : > { %v2216_v13 = vpop.permute.xlu1 %551  ;;  %v550_v14 = vpop.permute.xlu0 %549  ;;  %p1627_p11 = pnand %p1626_p9, %p1620_p13 }
 0x172   : > { %2642 = vst [vmem:[#allocation20_spill] sm:$0xff] %v2216_v13  ;;  %v2219_v16 = vsel %vm569_vm1, %v548_v9, %v550_v14 }
 0x175   : > { %v556_v8 = vpop.permute.xlu1 %555  ;;  %v554_v24 = vpop.permute.xlu0 %553 }
 0x176   : > { %v2223_v7 = vsel %vm569_vm1, %v2216_v13, %v554_v24  ;;  %v2226_v12 = vsel %vm569_vm1, %v554_v24, %v556_v8 }
 0x177   : > { %2643 = vst [vmem:[#allocation21_spill] sm:$0xff] %v2223_v7 }
 0x179   : > { %v560_v27 = vpop.permute.xlu1 %559  ;;  %v2229_v31 = vpop.permute.xlu0 %557 }
 0x17a   : > { %2644 = vst [vmem:[#allocation22_spill] sm:$0xff] %v2229_v31  ;;  %v2234_v35 = vsel %vm569_vm1, %v2229_v31, %v560_v27 }
 0x17b   : > { %2645 = vst [vmem:[#allocation23_spill] sm:$0xff] %v2234_v35 }
 0x17d   : > { %v564_v36 = vpop.permute.xlu1 %563  ;;  %v562_v2 = vpop.permute.xlu0 %561 }
 0x17e   : > { %v2236_v42 = vadd.f32 %v564_v36, %v490_v4  ;;  %v2239_v45 = vsel %vm569_vm1, %v560_v27, %v562_v2 }
 0x17f   : > { %2647 = vst [vmem:[#allocation25_spill] sm:$0xff] %v2239_v45 }
 0x180   : > { %2646 = vst [vmem:[#allocation24_spill] sm:$0xff] %v2236_v42 }
 0x181   : > { %v566_v50 = vpop.permute.xlu0 %565 }
 0x182   : > { %v576_v54 = vsel %vm569_vm1, %v564_v36, %v566_v50 }
 0x183   : > { %v2244_v55 = vadd.f32 %v576_v54, %v491_v49 }
 0x185   : > { %2648 = vst [vmem:[#allocation26_spill] sm:$0xff] %v2244_v55 }
 0x18e   : > { %v915_v57 = vpop.permute.xlu1 %914 }
 0x18f   : > { %v927_v35 = vmul.f32 %v915_v57, %v2061_v61 }
 0x192   : > { %v568_v60 = vpop.permute.xlu1 %567  ;;  %v911_v63 = vpop.permute.xlu0 %910 }
 0x193   : > { %v577_v1 = vsel %vm569_vm1, %v566_v50, %v568_v60  ;;  %v923_v58 = vmul.f32 0.0, %v911_v63  ;;  %v925_v42 = vmul.f32 %v911_v63, %v2052_v53 }
 0x194   : > { %v2249_v5 = vadd.f32 %v577_v1, %v492_v59  ;;  %v924_v59 = vmul.f32 %v911_v63, %v2043_v47 }
 0x196   : > { %2649 = vst [vmem:[#allocation27_spill] sm:$0xff] %v2249_v5  ;;  %v2251_v6 = vpop.permute.xlu1 %692  ;;  %v2253_v9 = vpop.permute.xlu0 %694 }
 0x19a   : > { %v2255_v3 = vpop.permute.xlu1 %696  ;;  %v2257_v14 = vpop.permute.xlu0 %698 }
 0x19e   : > { %v2259_v8 = vpop.permute.xlu1 %700  ;;  %v2261_v24 = vpop.permute.xlu0 %702 }
 0x1a2   : > { %v2263_v23 = vpop.permute.xlu1 %704  ;;  %v2265_v0 = vpop.permute.xlu0 %706 }
 0x1a3   : > { %v735_v11 = vadd.f32 %v2265_v0, %v659_v56  ;;  %v658_v56 = vmul.f32 %v2159_v34, %v2061_v61  ;;  %v655_v61 = vmul.f32 %v2142_v17, %v2043_v47 }
 0x1a6   : > { %v2267_v25 = vpop.permute.xlu1 %969  ;;  %v972_v27 = vpop.permute.xlu0 %971 }
 0x1a7   : > { %v2271_v32 = vsel %vm460_vm0, %v2267_v25, %v972_v27 }
 0x1aa   : > { %v974_v4 = vpop.permute.xlu1 %973  ;;  %v2273_v36 = vpop.permute.xlu0 %975 }
 0x1ab   : > { %v2276_v2 = vsel %vm460_vm0, %v972_v27, %v974_v4  ;;  %v926_v4 = vmul.f32 0.0, %v915_v57 }
 0x1ae   : > { %v978_v18 = vpop.permute.xlu1 %977  ;;  %v980_v49 = vpop.permute.xlu0 %979 }
 0x1af   : > { %v2280_v50 = vsel %vm460_vm0, %v2273_v36, %v978_v18  ;;  %v2283_v54 = vsel %vm460_vm0, %v978_v18, %v980_v49 }
 0x1b2   : > { %v982_v60 = vpop.permute.xlu1 %981  ;;  %v984_v1 = vpop.permute.xlu0 %983 }
 0x1b3   : > { %v2286_v55 = vadd.f32 %v982_v60, %v923_v58  ;;  %v997_v5 = vsel %vm460_vm0, %v982_v60, %v984_v1  ;;  %v928_v58 = vmul.f32 %v915_v57, %v2063_v62  ;;  %v650_v57 = vmul.f32 %v2150_v30, %v2030_v38 }
 0x1b4   : > { %v2289_v27 = vadd.f32 %v997_v5, %v924_v59  ;;  %v648_v5 = vmul.f32 0.0, %v2150_v30  ;;  %v711_v62 = vsel %vm460_vm0, %v2263_v23, %v2265_v0 }
 0x1b6   : > { %v986_v31 = vpop.permute.xlu1 %985  ;;  %v988_v7 = vpop.permute.xlu0 %987 }
 0x1b7   : > { %v998_v51 = vsel %vm460_vm0, %v984_v1, %v986_v31  ;;  %v2293_v18 = vadd.f32 %v988_v7, %v926_v4  ;;  %v724_v31 = vadd.f32 %v2251_v6, %v648_v5  ;;  %v651_v1 = vmul.f32 0.0, %v2085_v19 }
 0x1b8   : > { %v2295_v49 = vadd.f32 %v998_v51, %v925_v42  ;;  %v653_v5 = vmul.f32 %v2085_v19, %v2035_v41 }
 0x1b9   : > { %v727_v45 = vadd.f32 %v2255_v3, %v651_v1 }
 0x1ba   : > { %v990_v10 = vpop.permute.xlu1 %989  ;;  %v992_v13 = vpop.permute.xlu0 %991 }
 0x1bb   : > { %v999_v59 = vsel %vm460_vm0, %v988_v7, %v990_v10  ;;  %v1000_v63 = vsel %vm460_vm0, %v990_v10, %v992_v13  ;;  %v726_v10 = vadd.f32 %v2253_v9, %v650_v57 }
 0x1bc   : > { %v2302_v60 = vadd.f32 %v999_v59, %v927_v35  ;;  %v2304_v29 = vadd.f32 %v1000_v63, %v928_v58  ;;  %v729_v63 = vadd.f32 %v2257_v14, %v653_v5 }
 0x1be   : > { %v777_v51 = vpop.permute.xlu1 %776  ;;  %v779_v42 = vpop.permute.xlu0 %778 }
 0x1bf   : > { %v820_v4 = vadd.f32 %v777_v51, %v724_v31 }
 0x1c1   : > { %844 = vrot.lane.b32.xlu1 %v820_v4, %s1722_s24  ;;  %v654_v4 = vmul.f32 0.0, %v2142_v17 }
 0x1c2   : > { %v781_v13 = vpop.permute.xlu1 %780  ;;  %v783_v7 = vpop.permute.xlu0 %782 }
 0x1c3   : > { %v801_v35 = vsel %vm569_vm1, %v779_v42, %v781_v13  ;;  %v823_v58 = vadd.f32 %v783_v7, %v727_v45  ;;  %v730_v13 = vadd.f32 %v2259_v8, %v654_v4  ;;  %v709_v4 = vsel %vm460_vm0, %v2255_v3, %v2257_v14 }
 0x1c4   : > { %v822_v59 = vadd.f32 %v801_v35, %v726_v10  ;;  %v657_v10 = vmul.f32 0.0, %v2159_v34  ;;  %v708_v14 = vsel %vm460_vm0, %v2251_v6, %v2253_v9  ;;  %v734_v6 = vadd.f32 %v711_v62, %v658_v56 }
 0x1c5   : > { %850 = vrot.lane.b32.xlu0 %v823_v58, %s1722_s24  ;;  %v656_v58 = vmul.f32 %v2142_v17, %v2052_v53  ;;  %v919_v62 = vmul.f32 %v2148_v28, %v2030_v38 }
 0x1c6   : > { %v785_v31 = vpop.permute.xlu1 %784  ;;  %848 = vrot.lane.b32.xlu1 %v822_v59, %s1722_s24  ;;  %v787_v1 = vpop.permute.xlu0 %786  ;;  %v733_v5 = vadd.f32 %v2263_v23, %v657_v10 }
 0x1c7   : > { %v803_v57 = vsel %vm569_vm1, %v785_v31, %v787_v1  ;;  %v732_v59 = vadd.f32 %v2261_v24, %v656_v58 }
 0x1c8   : > { %v825_v52 = vadd.f32 %v803_v57, %v729_v63 }
 0x1ca   : > { %v789_v45 = vpop.permute.xlu1 %788  ;;  %854 = vrot.lane.b32.xlu0 %v825_v52, %s1722_s24  ;;  %v791_v37 = vpop.permute.xlu0 %790 }
 0x1cb   : > { %v826_v35 = vadd.f32 %v789_v45, %v730_v13  ;;  %v652_v13 = vmul.f32 %v2085_v19, %v2032_v39  ;;  %v804_v0 = vsel %vm569_vm1, %v789_v45, %v791_v37 }
 0x1cd   : > { %856 = vrot.lane.b32.xlu1 %v826_v35, %s1722_s24  ;;  %v802_v35 = vsel %vm569_vm1, %v783_v7, %v785_v31  ;;  %v728_v58 = vadd.f32 %v709_v4, %v652_v13  ;;  %v649_v7 = vmul.f32 %v2150_v30, %v2019_v26  ;;  %v710_v30 = vsel %vm460_vm0, %v2259_v8, %v2261_v24 }
 0x1ce   : > { %v793_v1 = vpop.permute.xlu1 %792  ;;  %v795_v63 = vpop.permute.xlu0 %794 }
 0x1cf   : > { %v805_v52 = vsel %vm569_vm1, %v791_v37, %v793_v1  ;;  %v829_v57 = vadd.f32 %v795_v63, %v733_v5  ;;  %v824_v31 = vadd.f32 %v802_v35, %v728_v58  ;;  %v725_v4 = vadd.f32 %v708_v14, %v649_v7 }
 0x1d0   : > { %v828_v10 = vadd.f32 %v805_v52, %v732_v59  ;;  %v800_v59 = vsel %vm569_vm1, %v777_v51, %v779_v42  ;;  %v918_v37 = vmul.f32 %v2148_v28, %v2019_v26  ;;  %v920_v7 = vmul.f32 0.0, %v2157_v33 }
 0x1d1   : > { %862 = vrot.lane.b32.xlu0 %v829_v57, %s1722_s24  ;;  %v821_v34 = vadd.f32 %v800_v59, %v725_v4 }
 0x1d2   : > { %v797_v21 = vpop.permute.xlu1 %796  ;;  %860 = vrot.lane.b32.xlu1 %v828_v10, %s1722_s24  ;;  %v799_v3 = vpop.permute.xlu0 %798  ;;  %v917_v10 = vmul.f32 0.0, %v2148_v28  ;;  %v1014_v14 = vadd.f32 %v2271_v32, %v918_v37  ;;  %v921_v32 = vmul.f32 %v2157_v33, %v2032_v39  ;;  %v922_v28 = vmul.f32 %v2157_v33, %v2035_v41 }
 0x1d3   : > { %v807_v19 = vsel %vm569_vm1, %v797_v21, %v799_v3  ;;  %v806_v1 = vsel %vm569_vm1, %v795_v63, %v797_v21  ;;  %v731_v21 = vadd.f32 %v710_v30, %v655_v61 }
 0x1d4   : > { %v831_v5 = vadd.f32 %v807_v19, %v735_v11  ;;  %v830_v11 = vadd.f32 %v806_v1, %v734_v6  ;;  %v1013_v58 = vadd.f32 %v2267_v25, %v917_v10  ;;  %v1015_v1 = vadd.f32 %v2276_v2, %v919_v62 }
 0x1d5   : > { %v827_v63 = vadd.f32 %v804_v0, %v731_v21  ;;  %v1016_v6 = vadd.f32 %v2273_v36, %v920_v7  ;;  %v1017_v2 = vadd.f32 %v2280_v50, %v921_v32  ;;  %v462_v32 = vsel %vm460_vm0, %v2168_v40, %v2172_v43 }
 0x1d6   : > { %v1066_v9 = vpop.permute.xlu1 %1065  ;;  %852 = vrot.lane.b32.xlu1 %v824_v31, %s1722_s24  ;;  %866 = vrot.lane.b32.xlu0 %v831_v5, %s1722_s24  ;;  %v1068_v23 = vpop.permute.xlu0 %1067 }
 0x1d7   : > { %v1089_v3 = vsel %vm569_vm1, %v1066_v9, %v1068_v23  ;;  %v1109_v19 = vadd.f32 %v1066_v9, %v1013_v58 }
 0x1d8   : > { %v1110_v56 = vadd.f32 %v1089_v3, %v1014_v14 }
 0x1da   : > { %v1070_v51 = vpop.permute.xlu1 %1069  ;;  %864 = vrot.lane.b32.xlu1 %v830_v11, %s1722_s24  ;;  %846 = vrot.lane.b32.xlu0 %v821_v34, %s1722_s24  ;;  %v1072_v42 = vpop.permute.xlu0 %1071  ;;  %v1018_v11 = vadd.f32 %v2283_v54, %v922_v28 }
 0x1db   : > { %v1090_v31 = vsel %vm569_vm1, %v1068_v23, %v1070_v51  ;;  %v1112_v9 = vadd.f32 %v1072_v42, %v1016_v6 }
 0x1dc   : > { %v1111_v61 = vadd.f32 %v1090_v31, %v1015_v1  ;;  %v386_v31 = vmul.f32 %v2009_v20, %v2030_v38 }
 0x1de   : > { %v1074_v52 = vpop.permute.xlu1 %1073  ;;  %858 = vrot.lane.b32.xlu0 %v827_v63, %s1722_s24  ;;  %v1076_v57 = vpop.permute.xlu0 %1075 }
 0x1df   : > { %v1091_v23 = vsel %vm569_vm1, %v1072_v42, %v1074_v52  ;;  %v1092_v36 = vsel %vm569_vm1, %v1074_v52, %v1076_v57 }
 0x1e0   : > { %v1113_v21 = vadd.f32 %v1091_v23, %v1017_v2  ;;  %v1114_v51 = vadd.f32 %v1092_v36, %v1018_v11  ;;  %v463_v2 = vsel %vm460_vm0, %v2174_v44, %v2180_v46  ;;  %v2650_v36 = vld [vmem:[#allocation12_spill] sm:$0xff] }
 0x1e2   : > { %v1078_v8 = vpop.permute.xlu1 %1077  ;;  %v1080_v24 = vpop.permute.xlu0 %1079 }
 0x1e3   : > { %v1093_v33 = vsel %vm569_vm1, %v1078_v8, %v1080_v24  ;;  %v1115_v10 = vadd.f32 %v1078_v8, %v2286_v55 }
 0x1e4   : > { %v1116_v50 = vadd.f32 %v1093_v33, %v2289_v27  ;;  %v2652_v33 = vld [vmem:[#allocation17_spill] sm:$0xff] }
 0x1e6   : > { %v1082_v13 = vpop.permute.xlu1 %1081  ;;  %v1084_v17 = vpop.permute.xlu0 %1083 }
 0x1e7   : > { %v1094_v52 = vsel %vm569_vm1, %v1080_v24, %v1082_v13  ;;  %v1118_v3 = vadd.f32 %v1084_v17, %v2293_v18 }
 0x1e8   : > { %v1117_v37 = vadd.f32 %v1094_v52, %v2295_v49 }
 0x1ea   : > { %v1086_v45 = vpop.permute.xlu1 %1085  ;;  %v1088_v35 = vpop.permute.xlu0 %1087 }
 0x1eb   : > { %v1096_v58 = vsel %vm569_vm1, %v1086_v45, %v1088_v35  ;;  %v1095_v55 = vsel %vm569_vm1, %v1084_v17, %v1086_v45 }
 0x1ec   : > { %v1120_v27 = vadd.f32 %v1096_v58, %v2304_v29  ;;  %v1119_v13 = vadd.f32 %v1095_v55, %v2302_v60 }
 0x1ee   : > { %v1131_v5 = vpop.permute.xlu1 %1130  ;;  %v1133_v59 = vpop.permute.xlu0 %1132 }
 0x1ef   : > { %v1135_v4 = vsel %vm1134_vm2, %v1131_v5, %v1133_v59  ;;  %v1139_v25 = vmul.f32 %v1131_v5, %v1109_v19  ;;  %v1141_v34 = vmul.f32 %v1133_v59, %v1111_v61  ;;  %v1142_v0 = vmul.f32 %v1131_v5, %v1112_v9 }
 0x1f0   : > { %v1140_v30 = vmul.f32 %v1135_v4, %v1110_v56  ;;  %v1143_v63 = vmul.f32 %v1135_v4, %v1113_v21  ;;  %v1144_v42 = vmul.f32 %v1133_v59, %v1114_v51  ;;  %v1145_v54 = vmul.f32 %v1131_v5, %v1115_v10 }
 0x1f1   : > { %1163 = vrot.lane.b32.xlu1 %v1139_v25, %s1723_s10  ;;  %v1146_v57 = vmul.f32 %v1135_v4, %v1116_v50  ;;  %v1147_v8 = vmul.f32 %v1133_v59, %v1117_v37  ;;  %v1148_v24 = vmul.f32 %v1131_v5, %v1118_v3  ;;  %v1149_v49 = vmul.f32 %v1135_v4, %v1119_v13 }
 0x1f2   : > { %1165 = vrot.lane.b32.xlu0 %v1140_v30, %s1723_s10  ;;  %v1150_v35 = vmul.f32 %v1133_v59, %v1120_v27  ;;  %v483_v5 = vadd.f32 %v2172_v43, %v386_v31  ;;  %v389_v25 = vmul.f32 %v2013_v22, %v2035_v41  ;;  %v387_v51 = vmul.f32 0.0, %v2013_v22 }
 0x1f4   : > { %v592_v1 = vadd.f32 %v2219_v16, %v483_v5  ;;  %v486_v6 = vadd.f32 %v2182_v48, %v389_v25  ;;  %v385_v16 = vmul.f32 %v2009_v20, %v2019_v26  ;;  %v484_v10 = vadd.f32 %v463_v2, %v387_v51  ;;  %v2658_v25 = vld [vmem:[#allocation18_spill] sm:$0xff]  ;;  %v2661_v51 = vld [vmem:[#allocation21_spill] sm:$0xff] }
 0x1f5   : > { %1167 = vrot.lane.b32.xlu1 %v1141_v34, %s1723_s10  ;;  %v392_v34 = vmul.f32 %v2650_v36, %v2052_v53  ;;  %v2653_v53 = vld [vmem:[#allocation14_spill] sm:$0xff] }
 0x1f6   : > { %1169 = vrot.lane.b32.xlu0 %v1142_v0, %s1723_s10  ;;  %v622_v38 = vmul.f32 %v2077_v15, %v592_v1  ;;  %v595_v28 = vadd.f32 %v2226_v12, %v486_v6  ;;  %v482_v23 = vadd.f32 %v462_v32, %v385_v16  ;;  %v2651_v0 = vld [vmem:[#allocation19_spill] sm:$0xff]  ;;  %v391_v12 = vmul.f32 %v2650_v36, %v2043_v47 }
 0x1f7   : > { %v461_v44 = vsel %vm460_vm0, %v2653_v53, %v2168_v40  ;;  %v2657_v40 = vld [vmem:[#allocation20_spill] sm:$0xff] }
 0x1f8   : > { %v591_v21 = vadd.f32 %v2651_v0, %v482_v23  ;;  %v625_v26 = vmul.f32 %v2077_v15, %v595_v28  ;;  %v2659_v28 = vld [vmem:[#allocation23_spill] sm:$0xff] }
 0x1f9   : > { %1171 = vrot.lane.b32.xlu1 %v1143_v63, %s1723_s10  ;;  %v489_v63 = vadd.f32 %v2652_v33, %v392_v34  ;;  %v390_v34 = vmul.f32 0.0, %v2650_v36 }
 0x1fa   : > { %1173 = vrot.lane.b32.xlu0 %v1144_v42, %s1723_s10  ;;  %v384_v42 = vmul.f32 0.0, %v2009_v20  ;;  %v2656_v20 = vld [vmem:[#allocation13_spill] sm:$0xff] }
 0x1fb   : > { %v2470_v58 = vsel %vm615_vm3, %v2656_v20, %v2077_v15 }
 0x1fc   : > { %v621_v27 = vmul.f32 %v2470_v58, %v591_v21  ;;  %v481_v13 = vadd.f32 %v461_v44, %v384_v42 }
 0x1fd   : > { %1175 = vrot.lane.b32.xlu1 %v1145_v54, %s1723_s10  ;;  %v2654_v54 = vld [vmem:[#allocation16_spill] sm:$0xff] }
 0x1fe   : > { %1177 = vrot.lane.b32.xlu0 %v1146_v57, %s1723_s10  ;;  %v466_v47 = vsel %vm460_vm0, %v2654_v54, %v2652_v33  ;;  %v2655_v57 = vld [vmem:[#allocation25_spill] sm:$0xff]  ;;  %v590_v6 = vadd.f32 %v2658_v25, %v481_v13  ;;  %v2664_v13 = vld [vmem:[#allocation27_spill] sm:$0xff] }
 0x1ff   : > { %v598_v37 = vadd.f32 %v2655_v57, %v489_v63  ;;  %v488_v31 = vadd.f32 %v466_v47, %v391_v12  ;;  %v2663_v57 = vld [vmem:[#allocation24_spill] sm:$0xff] }
 0x200   : > { %v620_v21 = vmul.f32 %v2656_v20, %v590_v6 }
 0x201   : > { %1179 = vrot.lane.b32.xlu1 %v1147_v8, %s1723_s10  ;;  %v593_v8 = vadd.f32 %v2657_v40, %v484_v10  ;;  %v628_v32 = vmul.f32 %v2077_v15, %v598_v37  ;;  %v2662_v10 = vld [vmem:[#allocation22_spill] sm:$0xff]  ;;  %v629_v37 = vmul.f32 %v2656_v20, %v2663_v57 }
 0x202   : > { %1181 = vrot.lane.b32.xlu0 %v1148_v24, %s1723_s10 }
 0x203   : > { %v623_v16 = vmul.f32 %v2656_v20, %v593_v8 }
 0x205   : > { %1183 = vrot.lane.b32.xlu1 %v1149_v49, %s1723_s10 }
 0x206   : > { %1185 = vrot.lane.b32.xlu0 %v1150_v35, %s1723_s10  ;;  %v464_v35 = vsel %vm460_vm0, %v2180_v46, %v2182_v48  ;;  %v597_v46 = vadd.f32 %v2659_v28, %v488_v31 }
 0x208   : > { %v627_v33 = vmul.f32 %v2470_v58, %v597_v46 }
 0x233   : > { %v2407_v18 = vpop.permute.xlu1 %844 }
 0x237   : > { %v2409_v17 = vpop.permute.xlu0 %850 }
 0x238   : > { %v849_v45 = vpop.permute.xlu1 %848 }
 0x239   : > { %v891_v9 = vadd.f32 %v849_v45, %v622_v38 }
 0x23c   : > { %v2411_v14 = vpop.permute.xlu0 %854 }
 0x23d   : > { %v894_v50 = vadd.f32 %v2411_v14, %v625_v26 }
 0x23f   : > { %v2413_v29 = vpop.permute.xlu1 %856 }
 0x243   : > { %v2415_v60 = vpop.permute.xlu0 %862 }
 0x244   : > { %v2417_v62 = vpop.permute.xlu1 %860 }
 0x245   : > { %v897_v23 = vadd.f32 %v2417_v62, %v628_v32 }
 0x248   : > { %v2419_v19 = vpop.permute.xlu0 %866  ;;  %v2421_v7 = vpop.permute.xlu1 %852 }
 0x249   : > { %v871_v38 = vsel %vm868_vm4, %v2409_v17, %v2421_v7  ;;  %v872_v53 = vsel %vm868_vm4, %v2421_v7, %v2411_v14 }
 0x24c   : > { %v2423_v56 = vpop.permute.xlu0 %846  ;;  %v2428_v59 = vpop.permute.xlu1 %864 }
 0x24d   : > { %v870_v3 = vsel %vm868_vm4, %v2423_v56, %v849_v45  ;;  %v388_v45 = vmul.f32 %v2013_v22, %v2032_v39  ;;  %v2660_v22 = vld [vmem:[#allocation15_spill] sm:$0xff]  ;;  %v869_v17 = vsel %vm868_vm4, %v2407_v18, %v2423_v56 }
 0x24e   : > { %v890_v5 = vadd.f32 %v870_v3, %v621_v27  ;;  %v465_v39 = vsel %vm460_vm0, %v2660_v22, %v2654_v54  ;;  %v889_v56 = vadd.f32 %v869_v17, %v620_v21 }
 0x24f   : > { %v487_v18 = vadd.f32 %v465_v39, %v390_v34 }
 0x250   : > { %v2431_v4 = vpop.permute.xlu0 %858 }
 0x251   : > { %v873_v27 = vsel %vm868_vm4, %v2413_v29, %v2431_v4  ;;  %v876_v29 = vsel %vm868_vm4, %v2428_v59, %v2419_v19 }
 0x263   : > { %v2436_v30 = vpop.permute.xlu1 %1163 }
 0x264   : > { %v2442_v61 = vpop.permute.xlu0 %1165 }
 0x265   : > { %v1188_v36 = vsel %vm1187_vm5, %v2436_v30, %v2442_v61  ;;  %v875_v30 = vsel %vm868_vm4, %v2415_v60, %v2428_v59 }
 0x266   : > { %v898_v8 = vadd.f32 %v875_v30, %v629_v37 }
 0x267   : > { %v1168_v41 = vpop.permute.xlu1 %1167 }
 0x268   : > { %v1210_v43 = vadd.f32 %v1168_v41, %v891_v9  ;;  %v1170_v11 = vpop.permute.xlu0 %1169  ;;  %v1189_v49 = vsel %vm1187_vm5, %v2442_v61, %v1168_v41  ;;  %v485_v9 = vadd.f32 %v464_v35, %v388_v45  ;;  %v1208_v61 = vadd.f32 %v1188_v36, %v889_v56 }
 0x269   : > { %v1209_v48 = vadd.f32 %v1189_v49, %v890_v5  ;;  %v631_v49 = vmul.f32 %v2077_v15, %v2664_v13 }
 0x26a   : > { %1236 = vrot.lane.b32.xlu1 %v1210_v43, %s1724_s6  ;;  %v892_v43 = vadd.f32 %v871_v38, %v623_v16  ;;  %v594_v26 = vadd.f32 %v2661_v51, %v485_v9 }
 0x26b   : > { %v1172_v52 = vpop.permute.xlu1 %1171  ;;  %v900_v5 = vadd.f32 %v2419_v19, %v631_v49 }
 0x26c   : > { %v1174_v55 = vpop.permute.xlu0 %1173  ;;  %v1190_v41 = vsel %vm1187_vm5, %v1170_v11, %v1172_v52  ;;  %v874_v11 = vsel %vm868_vm4, %v2431_v4, %v2417_v62  ;;  %v624_v54 = vmul.f32 %v2470_v58, %v594_v26  ;;  %v2665_v4 = vld [vmem:[#allocation26_spill] sm:$0xff] }
 0x26d   : > { %v1213_v24 = vadd.f32 %v1174_v55, %v894_v50  ;;  %v1211_v63 = vadd.f32 %v1190_v41, %v892_v43  ;;  %v896_v44 = vadd.f32 %v874_v11, %v627_v33  ;;  %v596_v50 = vadd.f32 %v2662_v10, %v487_v18 }
 0x26e   : > { %v1191_v3 = vsel %vm1187_vm5, %v1172_v52, %v1174_v55  ;;  %v893_v7 = vadd.f32 %v872_v53, %v624_v54 }
 0x26f   : > { %v1176_v1 = vpop.permute.xlu1 %1175  ;;  %1242 = vrot.lane.b32.xlu0 %v1213_v24, %s1724_s6  ;;  %v626_v60 = vmul.f32 %v2656_v20, %v596_v50  ;;  %v630_v20 = vmul.f32 %v2470_v58, %v2665_v4 }
 0x270   : > { %v1178_v2 = vpop.permute.xlu0 %1177  ;;  %v1212_v24 = vadd.f32 %v1191_v3, %v893_v7 }
 0x271   : > { %v1192_v52 = vsel %vm1187_vm5, %v1176_v1, %v1178_v2  ;;  %v895_v35 = vadd.f32 %v873_v27, %v626_v60  ;;  %v899_v25 = vadd.f32 %v876_v29, %v630_v20 }
 0x273   : > { %v1180_v0 = vpop.permute.xlu1 %1179  ;;  %1234 = vrot.lane.b32.xlu0 %v1209_v48, %s1724_s6  ;;  %v1214_v15 = vadd.f32 %v1192_v52, %v895_v35 }
 0x274   : > { %v1216_v12 = vadd.f32 %v1180_v0, %v897_v23  ;;  %v1193_v42 = vsel %vm1187_vm5, %v1178_v2, %v1180_v0  ;;  %v1182_v47 = vpop.permute.xlu0 %1181 }
 0x275   : > { %v1215_v14 = vadd.f32 %v1193_v42, %v896_v44 }
 0x276   : > { %1248 = vrot.lane.b32.xlu1 %v1216_v12, %s1724_s6 }
 0x277   : > { %v1184_v62 = vpop.permute.xlu1 %1183  ;;  %1238 = vrot.lane.b32.xlu0 %v1211_v63, %s1724_s6 }
 0x278   : > { %v1194_v40 = vsel %vm1187_vm5, %v1182_v47, %v1184_v62  ;;  %v1186_v31 = vpop.permute.xlu0 %1185 }
 0x279   : > { %v1217_v55 = vadd.f32 %v1194_v40, %v898_v8  ;;  %v1195_v1 = vsel %vm1187_vm5, %v1184_v62, %v1186_v31  ;;  %v1219_v45 = vadd.f32 %v1186_v31, %v900_v5 }
 0x27a   : > { %1232 = vrot.lane.b32.xlu1 %v1208_v61, %s1724_s6  ;;  %v1218_v6 = vadd.f32 %v1195_v1, %v899_v25 }
 0x27b   : > { %1246 = vrot.lane.b32.xlu0 %v1215_v14, %s1724_s6 }
 0x27e   : > { %1240 = vrot.lane.b32.xlu1 %v1212_v24, %s1724_s6 }
 0x27f   : > { %1250 = vrot.lane.b32.xlu0 %v1217_v55, %s1724_s6 }
 0x282   : > { %1244 = vrot.lane.b32.xlu1 %v1214_v15, %s1724_s6 }
 0x283   : > { %1254 = vrot.lane.b32.xlu0 %v1219_v45, %s1724_s6 }
 0x286   : > { %1252 = vrot.lane.b32.xlu1 %v1218_v6, %s1724_s6 }
 0x2dc   : > { %v1237_v19 = vpop.permute.xlu1 %1236 }
 0x2e1   : > { %v1243_v32 = vpop.permute.xlu0 %1242 }
 0x2e5   : > { %v1235_v59 = vpop.permute.xlu0 %1234 }
 0x2e6   : > { %v1258_v38 = vsel %vm1256_vm6, %v1235_v59, %v1237_v19 }
 0x2e7   : > { %1274 = vst [vmem:[%s295_s27 + $0x8] sm:$0xff] %v1258_v38 }
 0x2e8   : > { %v1249_v58 = vpop.permute.xlu1 %1248 }
 0x2e9   : > { %v1239_v16 = vpop.permute.xlu0 %1238 }
 0x2ec   : > { %v1233_v28 = vpop.permute.xlu1 %1232 }
 0x2ed   : > { %v1257_v46 = vsel %vm1256_vm6, %v1233_v28, %v1235_v59  ;;  %v1247_v48 = vpop.permute.xlu0 %1246 }
 0x2ee   : > { %1273 = vst [vmem:[%s295_s27] sm:$0xff] %v1257_v46  ;;  %v1262_v9 = vsel %vm1256_vm6, %v1247_v48, %v1249_v58 }
 0x2ef   : > { %1278 = vst [vmem:[%s295_s27 + $0x28] sm:$0xff] %v1262_v9 }
 0x2f0   : > { %v1241_v23 = vpop.permute.xlu1 %1240 }
 0x2f1   : > { %v1259_v41 = vsel %vm1256_vm6, %v1239_v16, %v1241_v23  ;;  %v1260_v2 = vsel %vm1256_vm6, %v1241_v23, %v1243_v32  ;;  %v1251_v22 = vpop.permute.xlu0 %1250 }
 0x2f2   : > { %1275 = vst [vmem:[%s295_s27 + $0x10] sm:$0xff] %v1259_v41  ;;  %1276 = vst [vmem:[%s295_s27 + $0x18] sm:$0xff] %v1260_v2 }
 0x2f4   : > { %v1245_v39 = vpop.permute.xlu1 %1244 }
 0x2f5   : > { %v1261_v34 = vsel %vm1256_vm6, %v1245_v39, %v1247_v48  ;;  %v1255_v43 = vpop.permute.xlu0 %1254 }
 0x2f6   : > { %1277 = vst [vmem:[%s295_s27 + $0x20] sm:$0xff] %v1261_v34 }
 0x2f8   : > { %v1253_v17 = vpop.permute.xlu1 %1252 }
 0x2f9   : > { %v1263_v0 = vsel %vm1256_vm6, %v1251_v22, %v1253_v17  ;;  %v1264_v21 = vsel %vm1256_vm6, %v1253_v17, %v1255_v43 }
 0x2fa   : > { %1279 = vst [vmem:[%s295_s27 + $0x30] sm:$0xff] %v1263_v0  ;;  %1280 = vst [vmem:[%s295_s27 + $0x38] sm:$0xff] %v1264_v21 }
 0x2fb   : > { %1630 = shalt.err (!%p1627_p11)
}
 0x2fc   : > { %s1631_s9 = scalar_lea.hbm %s2559_s12, 1024  ;;  %s1635_s10 = scalar_lea.hbm %s2614_s4, 2048 }
 0x2fd   : > { %p1632_p1 = scmp.ne.s32.totalorder %s2559_s12, %s1631_s9  ;;  %p1636_p5 = scmp.lt.u32.totalorder %s2559_s12, %s2614_s4 }
 0x2fe   : > { %p1637_p4 = scmp.lt.u32.totalorder %s1635_s10, %s1631_s9  ;;  %p1639_p0 = scmp.lt.u32.totalorder %s1631_s9, %s2559_s12 }
 0x2ff   : > { %p1633_p6 = pnand %p1632_p1, %p2666_p3 }
 0x300   : > { %p1638_p8 = por %p1637_p4, %p1636_p5 }
 0x301   : > { %p1634_p2 = pneg %p1633_p6 }
 0x302   : > { %p1640_p12 = por %p1639_p0, %p1638_p8 }
 0x304   : > { %p1641_p13 = pnand %p1640_p12, %p1634_p2 }
 0x306   : > { %1644 = shalt.err (!%p1641_p13)
}
 0x307   : > { %s1726_s22 = smov 256   ;;  %s1727_s7 = smov 16  }
 0x308   : > { %1454 = dma.vmem_to_hbm [thread:$0]  (%p2666_p3), %s2554_s26, 1024, %s2559_s12, %s1282_s18, %s1726_s22, %s1726_s22, %s1727_s7  }
 0x309 PF: > { %s1313_s21 = sand.u32 1, %s1683_s15   ;;  %p2667_p7 = scmp.ne.s32.totalorder %s2628_s30, 0 }
 0x30a   : > { %p2668_p10 = scmp.ge.s32.totalorder %s1703_s20, 2  ;;  %s1314_s13 = scalar_lea.sflag [#allocation5], %s1313_s21 }
 0x30c   : > { %p1464_p9 = pnand %p2668_p10, %p2667_p7 }
 0x30e   : > { %1678 = dma.done.wait (!%p1464_p9), %s1314_s13, 1024  }
 0x30f   : > { %1680 = vsyncadd (!%p1464_p9), %s1314_s13, 4294966272  ;;  %s23_s20 = sadd.s32 1, %s1703_s20   ;;  %s2669_s15 = smov %s1687_s16 }
 0x310   : > { %p20_p11 = scmp.ge.s32.totalorder %s23_s20, 4   ;;  %s2670_s16 = smov %s1691_s17 }
 0x311   : > { %s2671_s17 = smov %s1809_s29  ;;  %s2672_s18 = smov %s1699_s19 }
 0x312   : > { %s2673_s19 = smov %s2675_s23  ;;  %22 = sbr.rel (!%p20_p11) target bundleno = 8 (0x8), region = 98 }
 0x319   :  { %1319 = vsyncpa [#allocation4], 1 }
 0x31a   :  { %1321 = vsyncpa [#allocation4 + $0x1], 1 }
 0x31b   :  { %1322 = vsyncpa [#allocation7], 1 }
 0x31c   :  { %1324 = vsyncpa [#allocation7 + $0x1], 1 }
 0x31d   :  { %1325 = vsyncpa [#allocation5], 1 }
 0x31e   :  { %1327 = vsyncpa [#allocation5 + $0x1], 1 }

</bundles_post_ra>
